<compile_context>
chip_gen: v5e
topology: v5e:2x2
jax: 0.10.0
libtpu: 0.0.40
codegen_flags: <defaults>
</compile_context>

<pallas_src>
import functools

import jax
import jax.numpy as jnp
import numpy as np
from jax import lax
from jax.experimental import pallas as pl
from jax.experimental.pallas import tpu as pltpu

EPS = 1e-07


# ---------------------------------------------------------------------------
# Static helpers (wrapper side; baked constants)
# ---------------------------------------------------------------------------
def _patch_offsets(ksize, W):
    """Flat lane offset (di*W + dj) for every patch position, i-major order."""
    pad = (ksize - 1) // 2
    return tuple((i - pad) * W + (j - pad)
                 for i in range(ksize) for j in range(ksize))


def _shift_mask(H, W, ksize):
    """(k*k, H*W) 0/1 mask: zero where the shifted neighbour is off-image
    (matches the zero padding of F.unfold / Conv2d)."""
    pad = (ksize - 1) // 2
    ys = np.arange(H)[:, None]
    xs = np.arange(W)[None, :]
    rows = []
    for i in range(ksize):
        for j in range(ksize):
            di, dj = i - pad, j - pad
            ok = (ys + di >= 0) & (ys + di < H) & (xs + dj >= 0) & (xs + dj < W)
            rows.append(ok.reshape(-1))
    return np.stack(rows, 0).astype(np.float32)


def _head_mask(C, kk, padsize, num_heads):
    """(Cq, Cv) mask.  Kernel q-rows are position-major (p*C + c, replicate-pad
    rows appended); torch's head split is over the F.unfold row order c*kk + p.
    m[a, b] = 1 iff kernel q-row `a` and v-row `b` belong to the same head."""
    Cq = C * kk + padsize
    Cv = C + padsize
    dq = Cq // num_heads
    dv = Cv // num_heads
    m = np.zeros((Cq, Cv), np.float32)
    for a in range(Cq):
        if a < C * kk:
            p, c = divmod(a, C)
            torch_row = c * kk + p
        else:
            torch_row = a                    # replicate-pad rows appended at end
        h = torch_row // dq
        m[a, h * dv:(h + 1) * dv] = 1.0
    return m


def _lane_shift(x, off, L):
    """out[:, l] = x[:, (l + off) % L].  Wraps are cancelled by the border mask."""
    off = off % L
    if off == 0:
        return x
    return jnp.concatenate([x[:, off:], x[:, :off]], axis=1)


# ---------------------------------------------------------------------------
# One fused kernel per image:
#   1x1 qkv conv (+ReLU on q,k) -> in-VMEM unfold -> multi-head linear
#   attention -> in-VMEM 3x3 im2col -> proj conv.
# ---------------------------------------------------------------------------
def _fused_kernel(x_ref, wqkv_ref, bqkv_ref, wproj_ref, bproj_ref,
                  amask_ref, pmask_ref, hmask_ref, o_ref,
                  *, C, L, W, patch_size, padsize, num_heads, dv, use_branch1):
    x = x_ref[0]                                                   # (C, L) f32

    # ---- 1) qkv 1x1 conv: one fused (3C, C) x (C, L) matmul, ReLU on q,k ---
    qkv = jnp.dot(wqkv_ref[...], x,
                  preferred_element_type=jnp.float32) + bqkv_ref[...]
    q = jnp.maximum(qkv[0:C], 0.0)
    k = jnp.maximum(qkv[C:2 * C], 0.0)
    v = qkv[2 * C:3 * C]

    # ---- 2) F.unfold as values: lane-shifted + border-masked copies --------
    amask = amask_ref[...]                                         # (kk, L)
    q_slabs, k_slabs = [], []
    for p, off in enumerate(_patch_offsets(patch_size, W)):
        m = amask[p:p + 1, :]
        q_slabs.append(_lane_shift(q, off, L) * m)
        k_slabs.append(_lane_shift(k, off, L) * m)
    if padsize:                                  # replicate-pad (head split)
        q_slabs.append(jnp.broadcast_to(q_slabs[-1][C - 1:C, :], (padsize, L)))
        k_slabs.append(jnp.broadcast_to(k_slabs[-1][C - 1:C, :], (padsize, L)))
        v = jnp.concatenate(
            [v, jnp.broadcast_to(v[C - 1:C, :], (padsize, L))], axis=0)
    Qc = jnp.concatenate(q_slabs, axis=0)                          # (Cq, L)
    Kc = jnp.concatenate(k_slabs, axis=0)                          # (Cq, L)
    hm = hmask_ref[...]                                            # (Cq, Cv)

    # ---- 3) multi-head linear attention ------------------------------------
    if not use_branch1:
        # out = q @ (k^T v) / (q @ sum_l k + EPS); all heads in one deep
        # matmul by masking the cross-head blocks of the (Cq, Cv) products.
        kv = lax.dot_general(Kc, v, (((1,), (1,)), ((), ())),
                             preferred_element_type=jnp.float32)        # (Cq, Cv)
        num = lax.dot_general(kv * hm, Qc, (((0,), (0,)), ((), ())),
                              preferred_element_type=jnp.float32)       # (Cv, L)
        ksum = jnp.sum(Kc, axis=1, keepdims=True)                       # (Cq, 1)
        den = lax.dot_general(ksum * hm, Qc, (((0,), (0,)), ((), ())),
                              preferred_element_type=jnp.float32)       # (Cv, L)
        attn = num / (den + EPS)
    else:
        # (L, L)-score branch: only reachable when L <= 2*dq*dv/(dq+dv), so the
        # per-head (L, L) tile is always tiny and VMEM-safe.
        outs = []
        for h in range(num_heads):
            rsel = hm[:, h * dv:h * dv + 1]                             # (Cq, 1)
            s = lax.dot_general(Qc * rsel, Kc, (((0,), (0,)), ((), ())),
                                preferred_element_type=jnp.float32)     # (L, L)
            s = s / (jnp.sum(s, axis=1, keepdims=True) + EPS)
            vh = v[h * dv:(h + 1) * dv, :]                              # (dv, L)
            outs.append(lax.dot_general(vh, s, (((1,), (1,)), ((), ())),
                                        preferred_element_type=jnp.float32))
        attn = jnp.concatenate(outs, axis=0)                            # (Cv, L)
    attn = attn[0:C]                                # drop replicate-pad rows

    # ---- 4) 3x3 proj conv: in-VMEM im2col + one (C, 9C) x (9C, L) matmul ---
    pmask = pmask_ref[...]                                              # (9, L)
    cols = [_lane_shift(attn, off, L) * pmask[p:p + 1, :]
            for p, off in enumerate(_patch_offsets(3, W))]
    col = jnp.concatenate(cols, axis=0)                                 # (9C, L)
    y = jnp.dot(wproj_ref[...], col,
                preferred_element_type=jnp.float32) + bproj_ref[...]    # (C, L)
    o_ref[0] = y


# ---------------------------------------------------------------------------
# Full forward of convMultiheadAttetionV2 (single fused pallas_call)
# ---------------------------------------------------------------------------
def conv_mha_v2_forward(x, params, num_heads, patch_size):
    assert x.ndim == 4
    B, C, H, W = x.shape
    L = H * W
    kk = patch_size * patch_size
    assert patch_size % 2 == 1, "patchSize must be odd (same as the torch module)"

    d1 = C * kk
    padsize = 0
    if d1 % num_heads != 0:
        padsize = (d1 // num_heads + 1) * num_heads - d1
    Cq = d1 + padsize
    Cv = C + padsize
    assert Cv % num_heads == 0, (
        "convDim + padsize must be divisible by numHeads "
        "(the torch module's view() has the same requirement)")
    dq = Cq // num_heads
    dv = Cv // num_heads
    # same operation-count test as the torch linear_attn (l1 = l2 = L)
    use_branch1 = (L * dq * L + L * L * dv) <= (dv * L * dq + dv * dq * L)

    f32 = jnp.float32
    w_qkv = params["w_qkv"].reshape(3 * C, C).astype(f32)
    b_qkv = params["b_qkv"].reshape(3 * C, 1).astype(f32)
    # proj weight reordered to the kernel's position-major column order p*C + c
    w_proj = jnp.transpose(params["w_proj"].reshape(C, C, 3, 3),
                           (0, 2, 3, 1)).reshape(C, 9 * C).astype(f32)
    b_proj = params["b_proj"].reshape(C, 1).astype(f32)

    amask = jnp.asarray(_shift_mask(H, W, patch_size), f32)            # (kk, L)
    pmask = jnp.asarray(_shift_mask(H, W, 3), f32)                     # (9, L)
    hmask = jnp.asarray(_head_mask(C, kk, padsize, num_heads), f32)    # (Cq, Cv)

    x_bcl = x.reshape(B, C, L).astype(f32)   # contiguous (C, L) slab per image

    kern = functools.partial(
        _fused_kernel, C=C, L=L, W=W, patch_size=patch_size, padsize=padsize,
        num_heads=num_heads, dv=dv, use_branch1=use_branch1)

    # rough per-step VMEM footprint (f32 values + double-buffered blocks);
    # kept well under v7x's 64 MiB physical VMEM.
    est = 4 * L * (3 * C + 2 * Cq + Cv + 9 * C + 4 * C) + 4 * Cq * Cv
    if use_branch1:
        est += 4 * L * L
    vmem_limit = int(min(48 * 1024 * 1024, max(16 * 1024 * 1024, 4 * est)))

    y = pl.pallas_call(
        kern,
        grid=(B,),
        in_specs=[
            pl.BlockSpec((1, C, L), lambda b: (b, 0, 0)),   # x: one image/step
            pl.BlockSpec((3 * C, C), lambda b: (0, 0)),     # qkv weight
            pl.BlockSpec((3 * C, 1), lambda b: (0, 0)),     # qkv bias
            pl.BlockSpec((C, 9 * C), lambda b: (0, 0)),     # proj weight (perm)
            pl.BlockSpec((C, 1), lambda b: (0, 0)),         # proj bias
            pl.BlockSpec((kk, L), lambda b: (0, 0)),        # attn border mask
            pl.BlockSpec((9, L), lambda b: (0, 0)),         # proj border mask
            pl.BlockSpec((Cq, Cv), lambda b: (0, 0)),       # head mask
        ],
        out_specs=pl.BlockSpec((1, C, L), lambda b: (b, 0, 0)),
        out_shape=jax.ShapeDtypeStruct((B, C, L), f32),
        compiler_params=pltpu.CompilerParams(
            dimension_semantics=("parallel",),
            vmem_limit_bytes=vmem_limit),
    )(x_bcl, w_qkv, b_qkv, w_proj, b_proj, amask, pmask, hmask)
    return y.reshape(B, C, H, W)


# ---------------------------------------------------------------------------
# Pure-JAX f32 replica of the torch module (sanity check only)
# ---------------------------------------------------------------------------
def _reference_forward(x, params, num_heads, patch_size):
    B, C, H, W = x.shape
    L = H * W
    w_qkv = params["w_qkv"].reshape(3 * C, C)
    qkv = jnp.einsum("oc,bcl->bol", w_qkv, x.reshape(B, C, L)) \
        + params["b_qkv"].reshape(1, 3 * C, 1)
    q, k, v = qkv[:, :C], qkv[:, C:2 * C], qkv[:, 2 * C:]
    q, k = jnp.maximum(q, 0.0), jnp.maximum(k, 0.0)

    def unfold(t, ks):
        pad = (ks - 1) // 2
        t = t.reshape(B, C, H, W)
        tp = jnp.pad(t, ((0, 0), (0, 0), (pad, pad), (pad, pad)))
        cols = [tp[:, :, i:i + H, j:j + W] for i in range(ks) for j in range(ks)]
        return jnp.stack(cols, axis=2).reshape(B, C * ks * ks, L)

    qc, kc, xv = unfold(q, patch_size), unfold(k, patch_size), v
    padsize = 0
    if qc.shape[1] % num_heads:
        padsize = (qc.shape[1] // num_heads + 1) * num_heads - qc.shape[1]
        qc = jnp.pad(qc, ((0, 0), (0, padsize), (0, 0)), mode="edge")
        kc = jnp.pad(kc, ((0, 0), (0, padsize), (0, 0)), mode="edge")
        xv = jnp.pad(xv, ((0, 0), (0, padsize), (0, 0)), mode="edge")
    dq, dv = qc.shape[1] // num_heads, xv.shape[1] // num_heads
    q4 = qc.reshape(B, num_heads, dq, L).transpose(0, 1, 3, 2)
    k4 = kc.reshape(B, num_heads, dq, L).transpose(0, 1, 3, 2)
    v4 = xv.reshape(B, num_heads, dv, L).transpose(0, 1, 3, 2)
    if L * dq * L + L * L * dv <= dv * L * dq + dv * dq * L:
        s = q4 @ k4.transpose(0, 1, 3, 2)
        o = (s / (s.sum(-1, keepdims=True) + EPS)) @ v4
    else:
        o = q4 @ (k4.transpose(0, 1, 3, 2) @ v4)
        o = o / (q4 @ k4.transpose(0, 1, 3, 2).sum(-1, keepdims=True) + EPS)
    o = o.transpose(0, 1, 3, 2).reshape(B, -1, L)
    if padsize:
        o = o[:, :-padsize]
    col = unfold(o, 3)
    y = jnp.einsum("ok,bkl->bol", params["w_proj"].reshape(C, C * 9), col) \
        + params["b_proj"].reshape(1, C, 1)
    return y.reshape(B, C, H, W)


if __name__ == "__main__":
    def run_case(tag, B, C, H, W, num_heads, patch_size):
        key = jax.random.fold_in(jax.random.PRNGKey(0), tag)
        kx, kw1, kb1, kw2, kb2 = jax.random.split(key, 5)
        x = jax.random.normal(kx, (B, C, H, W), jnp.float32)
        params = {
            # nn.Conv2d(C, 3C, 1) weight / bias
            "w_qkv": 0.1 * jax.random.normal(kw1, (3 * C, C, 1, 1), jnp.float32),
            "b_qkv": 0.1 * jax.random.normal(kb1, (3 * C,), jnp.float32),
            # nn.Conv2d(C, C, 3, 1, 1) weight / bias
            "w_proj": 0.1 * jax.random.normal(kw2, (C, C, 3, 3), jnp.float32),
            "b_proj": 0.1 * jax.random.normal(kb2, (C,), jnp.float32),
        }
        fwd = jax.jit(conv_mha_v2_forward, static_argnums=(2, 3))
        y = fwd(x, params, num_heads, patch_size)
        jax.block_until_ready(y)
        assert y.shape == (B, C, H, W) and y.dtype == jnp.float32
        with jax.default_matmul_precision("highest"):
            ref = _reference_forward(x, params, num_heads, patch_size)
        err = float(jnp.max(jnp.abs(y - ref)) / (jnp.max(jnp.abs(ref)) + 1e-6))
        assert err < 0.03, (
            f"numeric mismatch (B={B},C={C},H={H},W={W},heads={num_heads},"
            f"patch={patch_size}): rel max err = {err}")

    # main config: padsize == 0, linear (k^T v) branch
    run_case(0, B=2, C=4, H=16, W=16, num_heads=4, patch_size=3)
    # padsize > 0 (replicate-padded heads), linear branch
    run_case(1, B=2, C=5, H=16, W=16, num_heads=4, patch_size=3)
    # tiny image / wide heads -> the (L, L)-score branch of linear_attn
    run_case(2, B=1, C=64, H=8, W=8, num_heads=1, patch_size=3)

    print("KERNEL_OK")
</pallas_src>

<mosaic_0001>
module attributes {stable_mosaic.version = 11 : i64} {
  func.func @_fused_kernel(%arg0: i32, %arg1: memref<1x4x256xf32, #tpu.memory_space<vmem>>, %arg2: memref<12x4xf32, #tpu.memory_space<vmem>>, %arg3: memref<12x1xf32, #tpu.memory_space<vmem>>, %arg4: memref<4x36xf32, #tpu.memory_space<vmem>>, %arg5: memref<4x1xf32, #tpu.memory_space<vmem>>, %arg6: memref<9x256xf32, #tpu.memory_space<vmem>>, %arg7: memref<9x256xf32, #tpu.memory_space<vmem>>, %arg8: memref<36x4xf32, #tpu.memory_space<vmem>>, %arg9: memref<1x4x256xf32, #tpu.memory_space<vmem>>) attributes {dimension_semantics = [#tpu.dimension_semantics<parallel>], iteration_bounds = array<i64: 2>, scalar_prefetch = 0 : i64, scratch_operands = 0 : i64, tpu.core_type = #tpu.core_type<tc>, window_params = [{transform_indices = @transform_0, window_bounds = array<i64: 1, 4, 256>}, {pipeline_mode = #tpu.pipeline_mode<synchronous>, transform_indices = @transform_1, window_bounds = array<i64: 12, 4>}, {pipeline_mode = #tpu.pipeline_mode<synchronous>, transform_indices = @transform_2, window_bounds = array<i64: 12, 1>}, {pipeline_mode = #tpu.pipeline_mode<synchronous>, transform_indices = @transform_3, window_bounds = array<i64: 4, 36>}, {pipeline_mode = #tpu.pipeline_mode<synchronous>, transform_indices = @transform_4, window_bounds = array<i64: 4, 1>}, {pipeline_mode = #tpu.pipeline_mode<synchronous>, transform_indices = @transform_5, window_bounds = array<i64: 9, 256>}, {pipeline_mode = #tpu.pipeline_mode<synchronous>, transform_indices = @transform_6, window_bounds = array<i64: 9, 256>}, {pipeline_mode = #tpu.pipeline_mode<synchronous>, transform_indices = @transform_7, window_bounds = array<i64: 36, 4>}, {transform_indices = @transform_8, window_bounds = array<i64: 1, 4, 256>}]} {
    %c0 = arith.constant 0 : index
    %c0_0 = arith.constant 0 : index
    %c0_1 = arith.constant 0 : index
    %0 = vector.load %arg1[%c0, %c0_0, %c0_1] : memref<1x4x256xf32, #tpu.memory_space<vmem>>, vector<1x4x256xf32>
    %1 = vector.shape_cast %0 : vector<1x4x256xf32> to vector<4x256xf32>
    %c0_2 = arith.constant 0 : index
    %c0_3 = arith.constant 0 : index
    %2 = vector.load %arg2[%c0_2, %c0_3] : memref<12x4xf32, #tpu.memory_space<vmem>>, vector<12x4xf32>
    %cst = arith.constant dense<0.000000e+00> : vector<12x256xf32>
    %3 = tpu.matmul %2, %1, %cst {dimension_numbers = #tpu.dot_dimension_numbers<[1], [0], [0], [1], [0, 0, 1, 1], [], []>} : vector<12x4xf32>, vector<4x256xf32>, vector<12x256xf32> -> vector<12x256xf32>
    %c0_4 = arith.constant 0 : index
    %c0_5 = arith.constant 0 : index
    %4 = vector.load %arg3[%c0_4, %c0_5] : memref<12x1xf32, #tpu.memory_space<vmem>>, vector<12x1xf32>
    %5 = vector.broadcast %4 : vector<12x1xf32> to vector<12x256xf32>
    %6 = arith.addf %3, %5 : vector<12x256xf32>
    %7 = vector.extract_strided_slice %6 {offsets = [0, 0], sizes = [4, 256], strides = [1, 1]} : vector<12x256xf32> to vector<4x256xf32>
    %cst_6 = arith.constant 0.000000e+00 : f32
    %8 = vector.broadcast %cst_6 : f32 to vector<4x256xf32>
    %9 = arith.maximumf %7, %8 : vector<4x256xf32>
    %10 = vector.extract_strided_slice %6 {offsets = [4, 0], sizes = [4, 256], strides = [1, 1]} : vector<12x256xf32> to vector<4x256xf32>
    %cst_7 = arith.constant 0.000000e+00 : f32
    %11 = vector.broadcast %cst_7 : f32 to vector<4x256xf32>
    %12 = arith.maximumf %10, %11 : vector<4x256xf32>
    %13 = vector.extract_strided_slice %6 {offsets = [8, 0], sizes = [4, 256], strides = [1, 1]} : vector<12x256xf32> to vector<4x256xf32>
    %c0_8 = arith.constant 0 : index
    %c0_9 = arith.constant 0 : index
    %14 = vector.load %arg6[%c0_8, %c0_9] : memref<9x256xf32, #tpu.memory_space<vmem>>, vector<9x256xf32>
    %15 = vector.extract_strided_slice %14 {offsets = [0, 0], sizes = [1, 256], strides = [1, 1]} : vector<9x256xf32> to vector<1x256xf32>
    %16 = vector.extract_strided_slice %9 {offsets = [0, 239], sizes = [4, 17], strides = [1, 1]} : vector<4x256xf32> to vector<4x17xf32>
    %17 = vector.extract_strided_slice %9 {offsets = [0, 0], sizes = [4, 239], strides = [1, 1]} : vector<4x256xf32> to vector<4x239xf32>
    %18 = tpu.concatenate %16, %17 in 1 : vector<4x17xf32>, vector<4x239xf32> -> vector<4x256xf32>
    %19 = vector.broadcast %15 : vector<1x256xf32> to vector<4x256xf32>
    %20 = arith.mulf %18, %19 : vector<4x256xf32>
    %21 = vector.extract_strided_slice %12 {offsets = [0, 239], sizes = [4, 17], strides = [1, 1]} : vector<4x256xf32> to vector<4x17xf32>
    %22 = vector.extract_strided_slice %12 {offsets = [0, 0], sizes = [4, 239], strides = [1, 1]} : vector<4x256xf32> to vector<4x239xf32>
    %23 = tpu.concatenate %21, %22 in 1 : vector<4x17xf32>, vector<4x239xf32> -> vector<4x256xf32>
    %24 = vector.broadcast %15 : vector<1x256xf32> to vector<4x256xf32>
    %25 = arith.mulf %23, %24 : vector<4x256xf32>
    %26 = vector.extract_strided_slice %14 {offsets = [1, 0], sizes = [1, 256], strides = [1, 1]} : vector<9x256xf32> to vector<1x256xf32>
    %27 = vector.extract_strided_slice %9 {offsets = [0, 240], sizes = [4, 16], strides = [1, 1]} : vector<4x256xf32> to vector<4x16xf32>
    %28 = vector.extract_strided_slice %9 {offsets = [0, 0], sizes = [4, 240], strides = [1, 1]} : vector<4x256xf32> to vector<4x240xf32>
    %29 = tpu.concatenate %27, %28 in 1 : vector<4x16xf32>, vector<4x240xf32> -> vector<4x256xf32>
    %30 = vector.broadcast %26 : vector<1x256xf32> to vector<4x256xf32>
    %31 = arith.mulf %29, %30 : vector<4x256xf32>
    %32 = vector.extract_strided_slice %12 {offsets = [0, 240], sizes = [4, 16], strides = [1, 1]} : vector<4x256xf32> to vector<4x16xf32>
    %33 = vector.extract_strided_slice %12 {offsets = [0, 0], sizes = [4, 240], strides = [1, 1]} : vector<4x256xf32> to vector<4x240xf32>
    %34 = tpu.concatenate %32, %33 in 1 : vector<4x16xf32>, vector<4x240xf32> -> vector<4x256xf32>
    %35 = vector.broadcast %26 : vector<1x256xf32> to vector<4x256xf32>
    %36 = arith.mulf %34, %35 : vector<4x256xf32>
    %37 = vector.extract_strided_slice %14 {offsets = [2, 0], sizes = [1, 256], strides = [1, 1]} : vector<9x256xf32> to vector<1x256xf32>
    %38 = vector.extract_strided_slice %9 {offsets = [0, 241], sizes = [4, 15], strides = [1, 1]} : vector<4x256xf32> to vector<4x15xf32>
    %39 = vector.extract_strided_slice %9 {offsets = [0, 0], sizes = [4, 241], strides = [1, 1]} : vector<4x256xf32> to vector<4x241xf32>
    %40 = tpu.concatenate %38, %39 in 1 : vector<4x15xf32>, vector<4x241xf32> -> vector<4x256xf32>
    %41 = vector.broadcast %37 : vector<1x256xf32> to vector<4x256xf32>
    %42 = arith.mulf %40, %41 : vector<4x256xf32>
    %43 = vector.extract_strided_slice %12 {offsets = [0, 241], sizes = [4, 15], strides = [1, 1]} : vector<4x256xf32> to vector<4x15xf32>
    %44 = vector.extract_strided_slice %12 {offsets = [0, 0], sizes = [4, 241], strides = [1, 1]} : vector<4x256xf32> to vector<4x241xf32>
    %45 = tpu.concatenate %43, %44 in 1 : vector<4x15xf32>, vector<4x241xf32> -> vector<4x256xf32>
    %46 = vector.broadcast %37 : vector<1x256xf32> to vector<4x256xf32>
    %47 = arith.mulf %45, %46 : vector<4x256xf32>
    %48 = vector.extract_strided_slice %14 {offsets = [3, 0], sizes = [1, 256], strides = [1, 1]} : vector<9x256xf32> to vector<1x256xf32>
    %49 = vector.extract_strided_slice %9 {offsets = [0, 255], sizes = [4, 1], strides = [1, 1]} : vector<4x256xf32> to vector<4x1xf32>
    %50 = vector.extract_strided_slice %9 {offsets = [0, 0], sizes = [4, 255], strides = [1, 1]} : vector<4x256xf32> to vector<4x255xf32>
    %51 = tpu.concatenate %49, %50 in 1 : vector<4x1xf32>, vector<4x255xf32> -> vector<4x256xf32>
    %52 = vector.broadcast %48 : vector<1x256xf32> to vector<4x256xf32>
    %53 = arith.mulf %51, %52 : vector<4x256xf32>
    %54 = vector.extract_strided_slice %12 {offsets = [0, 255], sizes = [4, 1], strides = [1, 1]} : vector<4x256xf32> to vector<4x1xf32>
    %55 = vector.extract_strided_slice %12 {offsets = [0, 0], sizes = [4, 255], strides = [1, 1]} : vector<4x256xf32> to vector<4x255xf32>
    %56 = tpu.concatenate %54, %55 in 1 : vector<4x1xf32>, vector<4x255xf32> -> vector<4x256xf32>
    %57 = vector.broadcast %48 : vector<1x256xf32> to vector<4x256xf32>
    %58 = arith.mulf %56, %57 : vector<4x256xf32>
    %59 = vector.extract_strided_slice %14 {offsets = [4, 0], sizes = [1, 256], strides = [1, 1]} : vector<9x256xf32> to vector<1x256xf32>
    %60 = vector.broadcast %59 : vector<1x256xf32> to vector<4x256xf32>
    %61 = arith.mulf %9, %60 : vector<4x256xf32>
    %62 = vector.broadcast %59 : vector<1x256xf32> to vector<4x256xf32>
    %63 = arith.mulf %12, %62 : vector<4x256xf32>
    %64 = vector.extract_strided_slice %14 {offsets = [5, 0], sizes = [1, 256], strides = [1, 1]} : vector<9x256xf32> to vector<1x256xf32>
    %65 = vector.extract_strided_slice %9 {offsets = [0, 1], sizes = [4, 255], strides = [1, 1]} : vector<4x256xf32> to vector<4x255xf32>
    %66 = vector.extract_strided_slice %9 {offsets = [0, 0], sizes = [4, 1], strides = [1, 1]} : vector<4x256xf32> to vector<4x1xf32>
    %67 = tpu.concatenate %65, %66 in 1 : vector<4x255xf32>, vector<4x1xf32> -> vector<4x256xf32>
    %68 = vector.broadcast %64 : vector<1x256xf32> to vector<4x256xf32>
    %69 = arith.mulf %67, %68 : vector<4x256xf32>
    %70 = vector.extract_strided_slice %12 {offsets = [0, 1], sizes = [4, 255], strides = [1, 1]} : vector<4x256xf32> to vector<4x255xf32>
    %71 = vector.extract_strided_slice %12 {offsets = [0, 0], sizes = [4, 1], strides = [1, 1]} : vector<4x256xf32> to vector<4x1xf32>
    %72 = tpu.concatenate %70, %71 in 1 : vector<4x255xf32>, vector<4x1xf32> -> vector<4x256xf32>
    %73 = vector.broadcast %64 : vector<1x256xf32> to vector<4x256xf32>
    %74 = arith.mulf %72, %73 : vector<4x256xf32>
    %75 = vector.extract_strided_slice %14 {offsets = [6, 0], sizes = [1, 256], strides = [1, 1]} : vector<9x256xf32> to vector<1x256xf32>
    %76 = vector.extract_strided_slice %9 {offsets = [0, 15], sizes = [4, 241], strides = [1, 1]} : vector<4x256xf32> to vector<4x241xf32>
    %77 = vector.extract_strided_slice %9 {offsets = [0, 0], sizes = [4, 15], strides = [1, 1]} : vector<4x256xf32> to vector<4x15xf32>
    %78 = tpu.concatenate %76, %77 in 1 : vector<4x241xf32>, vector<4x15xf32> -> vector<4x256xf32>
    %79 = vector.broadcast %75 : vector<1x256xf32> to vector<4x256xf32>
    %80 = arith.mulf %78, %79 : vector<4x256xf32>
    %81 = vector.extract_strided_slice %12 {offsets = [0, 15], sizes = [4, 241], strides = [1, 1]} : vector<4x256xf32> to vector<4x241xf32>
    %82 = vector.extract_strided_slice %12 {offsets = [0, 0], sizes = [4, 15], strides = [1, 1]} : vector<4x256xf32> to vector<4x15xf32>
    %83 = tpu.concatenate %81, %82 in 1 : vector<4x241xf32>, vector<4x15xf32> -> vector<4x256xf32>
    %84 = vector.broadcast %75 : vector<1x256xf32> to vector<4x256xf32>
    %85 = arith.mulf %83, %84 : vector<4x256xf32>
    %86 = vector.extract_strided_slice %14 {offsets = [7, 0], sizes = [1, 256], strides = [1, 1]} : vector<9x256xf32> to vector<1x256xf32>
    %87 = vector.extract_strided_slice %9 {offsets = [0, 16], sizes = [4, 240], strides = [1, 1]} : vector<4x256xf32> to vector<4x240xf32>
    %88 = vector.extract_strided_slice %9 {offsets = [0, 0], sizes = [4, 16], strides = [1, 1]} : vector<4x256xf32> to vector<4x16xf32>
    %89 = tpu.concatenate %87, %88 in 1 : vector<4x240xf32>, vector<4x16xf32> -> vector<4x256xf32>
    %90 = vector.broadcast %86 : vector<1x256xf32> to vector<4x256xf32>
    %91 = arith.mulf %89, %90 : vector<4x256xf32>
    %92 = vector.extract_strided_slice %12 {offsets = [0, 16], sizes = [4, 240], strides = [1, 1]} : vector<4x256xf32> to vector<4x240xf32>
    %93 = vector.extract_strided_slice %12 {offsets = [0, 0], sizes = [4, 16], strides = [1, 1]} : vector<4x256xf32> to vector<4x16xf32>
    %94 = tpu.concatenate %92, %93 in 1 : vector<4x240xf32>, vector<4x16xf32> -> vector<4x256xf32>
    %95 = vector.broadcast %86 : vector<1x256xf32> to vector<4x256xf32>
    %96 = arith.mulf %94, %95 : vector<4x256xf32>
    %97 = vector.extract_strided_slice %14 {offsets = [8, 0], sizes = [1, 256], strides = [1, 1]} : vector<9x256xf32> to vector<1x256xf32>
    %98 = vector.extract_strided_slice %9 {offsets = [0, 17], sizes = [4, 239], strides = [1, 1]} : vector<4x256xf32> to vector<4x239xf32>
    %99 = vector.extract_strided_slice %9 {offsets = [0, 0], sizes = [4, 17], strides = [1, 1]} : vector<4x256xf32> to vector<4x17xf32>
    %100 = tpu.concatenate %98, %99 in 1 : vector<4x239xf32>, vector<4x17xf32> -> vector<4x256xf32>
    %101 = vector.broadcast %97 : vector<1x256xf32> to vector<4x256xf32>
    %102 = arith.mulf %100, %101 : vector<4x256xf32>
    %103 = vector.extract_strided_slice %12 {offsets = [0, 17], sizes = [4, 239], strides = [1, 1]} : vector<4x256xf32> to vector<4x239xf32>
    %104 = vector.extract_strided_slice %12 {offsets = [0, 0], sizes = [4, 17], strides = [1, 1]} : vector<4x256xf32> to vector<4x17xf32>
    %105 = tpu.concatenate %103, %104 in 1 : vector<4x239xf32>, vector<4x17xf32> -> vector<4x256xf32>
    %106 = vector.broadcast %97 : vector<1x256xf32> to vector<4x256xf32>
    %107 = arith.mulf %105, %106 : vector<4x256xf32>
    %108 = tpu.concatenate %20, %31, %42, %53, %61, %69, %80, %91, %102 in 0 : vector<4x256xf32>, vector<4x256xf32>, vector<4x256xf32>, vector<4x256xf32>, vector<4x256xf32>, vector<4x256xf32>, vector<4x256xf32>, vector<4x256xf32>, vector<4x256xf32> -> vector<36x256xf32>
    %109 = tpu.concatenate %25, %36, %47, %58, %63, %74, %85, %96, %107 in 0 : vector<4x256xf32>, vector<4x256xf32>, vector<4x256xf32>, vector<4x256xf32>, vector<4x256xf32>, vector<4x256xf32>, vector<4x256xf32>, vector<4x256xf32>, vector<4x256xf32> -> vector<36x256xf32>
    %c0_10 = arith.constant 0 : index
    %c0_11 = arith.constant 0 : index
    %110 = vector.load %arg8[%c0_10, %c0_11] : memref<36x4xf32, #tpu.memory_space<vmem>>, vector<36x4xf32>
    %cst_12 = arith.constant dense<0.000000e+00> : vector<36x4xf32>
    %111 = tpu.matmul %109, %13, %cst_12 {dimension_numbers = #tpu.dot_dimension_numbers<[1], [1], [0], [0], [0, 0, 1, 0], [], []>} : vector<36x256xf32>, vector<4x256xf32>, vector<36x4xf32> -> vector<36x4xf32>
    %112 = arith.mulf %111, %110 : vector<36x4xf32>
    %cst_13 = arith.constant dense<0.000000e+00> : vector<4x256xf32>
    %113 = tpu.matmul %112, %108, %cst_13 {dimension_numbers = #tpu.dot_dimension_numbers<[0], [0], [1], [1], [0, 1, 1, 1], [], []>} : vector<36x4xf32>, vector<36x256xf32>, vector<4x256xf32> -> vector<4x256xf32>
    %cst_14 = arith.constant dense<0.000000e+00> : vector<36xf32>
    %114 = vector.multi_reduction <add>, %109, %cst_14 [1] : vector<36x256xf32> to vector<36xf32>
    %115 = vector.shape_cast %114 : vector<36xf32> to vector<36x1xf32>
    %116 = vector.broadcast %115 : vector<36x1xf32> to vector<36x4xf32>
    %117 = arith.mulf %116, %110 : vector<36x4xf32>
    %cst_15 = arith.constant dense<0.000000e+00> : vector<4x256xf32>
    %118 = tpu.matmul %117, %108, %cst_15 {dimension_numbers = #tpu.dot_dimension_numbers<[0], [0], [1], [1], [0, 1, 1, 1], [], []>} : vector<36x4xf32>, vector<36x256xf32>, vector<4x256xf32> -> vector<4x256xf32>
    %cst_16 = arith.constant 1.000000e-07 : f32
    %119 = vector.broadcast %cst_16 : f32 to vector<4x256xf32>
    %120 = arith.addf %118, %119 : vector<4x256xf32>
    %121 = arith.divf %113, %120 : vector<4x256xf32>
    %c0_17 = arith.constant 0 : index
    %c0_18 = arith.constant 0 : index
    %122 = vector.load %arg7[%c0_17, %c0_18] : memref<9x256xf32, #tpu.memory_space<vmem>>, vector<9x256xf32>
    %123 = vector.extract_strided_slice %121 {offsets = [0, 239], sizes = [4, 17], strides = [1, 1]} : vector<4x256xf32> to vector<4x17xf32>
    %124 = vector.extract_strided_slice %121 {offsets = [0, 0], sizes = [4, 239], strides = [1, 1]} : vector<4x256xf32> to vector<4x239xf32>
    %125 = tpu.concatenate %123, %124 in 1 : vector<4x17xf32>, vector<4x239xf32> -> vector<4x256xf32>
    %126 = vector.extract_strided_slice %122 {offsets = [0, 0], sizes = [1, 256], strides = [1, 1]} : vector<9x256xf32> to vector<1x256xf32>
    %127 = vector.broadcast %126 : vector<1x256xf32> to vector<4x256xf32>
    %128 = arith.mulf %125, %127 : vector<4x256xf32>
    %129 = vector.extract_strided_slice %121 {offsets = [0, 240], sizes = [4, 16], strides = [1, 1]} : vector<4x256xf32> to vector<4x16xf32>
    %130 = vector.extract_strided_slice %121 {offsets = [0, 0], sizes = [4, 240], strides = [1, 1]} : vector<4x256xf32> to vector<4x240xf32>
    %131 = tpu.concatenate %129, %130 in 1 : vector<4x16xf32>, vector<4x240xf32> -> vector<4x256xf32>
    %132 = vector.extract_strided_slice %122 {offsets = [1, 0], sizes = [1, 256], strides = [1, 1]} : vector<9x256xf32> to vector<1x256xf32>
    %133 = vector.broadcast %132 : vector<1x256xf32> to vector<4x256xf32>
    %134 = arith.mulf %131, %133 : vector<4x256xf32>
    %135 = vector.extract_strided_slice %121 {offsets = [0, 241], sizes = [4, 15], strides = [1, 1]} : vector<4x256xf32> to vector<4x15xf32>
    %136 = vector.extract_strided_slice %121 {offsets = [0, 0], sizes = [4, 241], strides = [1, 1]} : vector<4x256xf32> to vector<4x241xf32>
    %137 = tpu.concatenate %135, %136 in 1 : vector<4x15xf32>, vector<4x241xf32> -> vector<4x256xf32>
    %138 = vector.extract_strided_slice %122 {offsets = [2, 0], sizes = [1, 256], strides = [1, 1]} : vector<9x256xf32> to vector<1x256xf32>
    %139 = vector.broadcast %138 : vector<1x256xf32> to vector<4x256xf32>
    %140 = arith.mulf %137, %139 : vector<4x256xf32>
    %141 = vector.extract_strided_slice %121 {offsets = [0, 255], sizes = [4, 1], strides = [1, 1]} : vector<4x256xf32> to vector<4x1xf32>
    %142 = vector.extract_strided_slice %121 {offsets = [0, 0], sizes = [4, 255], strides = [1, 1]} : vector<4x256xf32> to vector<4x255xf32>
    %143 = tpu.concatenate %141, %142 in 1 : vector<4x1xf32>, vector<4x255xf32> -> vector<4x256xf32>
    %144 = vector.extract_strided_slice %122 {offsets = [3, 0], sizes = [1, 256], strides = [1, 1]} : vector<9x256xf32> to vector<1x256xf32>
    %145 = vector.broadcast %144 : vector<1x256xf32> to vector<4x256xf32>
    %146 = arith.mulf %143, %145 : vector<4x256xf32>
    %147 = vector.extract_strided_slice %122 {offsets = [4, 0], sizes = [1, 256], strides = [1, 1]} : vector<9x256xf32> to vector<1x256xf32>
    %148 = vector.broadcast %147 : vector<1x256xf32> to vector<4x256xf32>
    %149 = arith.mulf %121, %148 : vector<4x256xf32>
    %150 = vector.extract_strided_slice %121 {offsets = [0, 1], sizes = [4, 255], strides = [1, 1]} : vector<4x256xf32> to vector<4x255xf32>
    %151 = vector.extract_strided_slice %121 {offsets = [0, 0], sizes = [4, 1], strides = [1, 1]} : vector<4x256xf32> to vector<4x1xf32>
    %152 = tpu.concatenate %150, %151 in 1 : vector<4x255xf32>, vector<4x1xf32> -> vector<4x256xf32>
    %153 = vector.extract_strided_slice %122 {offsets = [5, 0], sizes = [1, 256], strides = [1, 1]} : vector<9x256xf32> to vector<1x256xf32>
    %154 = vector.broadcast %153 : vector<1x256xf32> to vector<4x256xf32>
    %155 = arith.mulf %152, %154 : vector<4x256xf32>
    %156 = vector.extract_strided_slice %121 {offsets = [0, 15], sizes = [4, 241], strides = [1, 1]} : vector<4x256xf32> to vector<4x241xf32>
    %157 = vector.extract_strided_slice %121 {offsets = [0, 0], sizes = [4, 15], strides = [1, 1]} : vector<4x256xf32> to vector<4x15xf32>
    %158 = tpu.concatenate %156, %157 in 1 : vector<4x241xf32>, vector<4x15xf32> -> vector<4x256xf32>
    %159 = vector.extract_strided_slice %122 {offsets = [6, 0], sizes = [1, 256], strides = [1, 1]} : vector<9x256xf32> to vector<1x256xf32>
    %160 = vector.broadcast %159 : vector<1x256xf32> to vector<4x256xf32>
    %161 = arith.mulf %158, %160 : vector<4x256xf32>
    %162 = vector.extract_strided_slice %121 {offsets = [0, 16], sizes = [4, 240], strides = [1, 1]} : vector<4x256xf32> to vector<4x240xf32>
    %163 = vector.extract_strided_slice %121 {offsets = [0, 0], sizes = [4, 16], strides = [1, 1]} : vector<4x256xf32> to vector<4x16xf32>
    %164 = tpu.concatenate %162, %163 in 1 : vector<4x240xf32>, vector<4x16xf32> -> vector<4x256xf32>
    %165 = vector.extract_strided_slice %122 {offsets = [7, 0], sizes = [1, 256], strides = [1, 1]} : vector<9x256xf32> to vector<1x256xf32>
    %166 = vector.broadcast %165 : vector<1x256xf32> to vector<4x256xf32>
    %167 = arith.mulf %164, %166 : vector<4x256xf32>
    %168 = vector.extract_strided_slice %121 {offsets = [0, 17], sizes = [4, 239], strides = [1, 1]} : vector<4x256xf32> to vector<4x239xf32>
    %169 = vector.extract_strided_slice %121 {offsets = [0, 0], sizes = [4, 17], strides = [1, 1]} : vector<4x256xf32> to vector<4x17xf32>
    %170 = tpu.concatenate %168, %169 in 1 : vector<4x239xf32>, vector<4x17xf32> -> vector<4x256xf32>
    %171 = vector.extract_strided_slice %122 {offsets = [8, 0], sizes = [1, 256], strides = [1, 1]} : vector<9x256xf32> to vector<1x256xf32>
    %172 = vector.broadcast %171 : vector<1x256xf32> to vector<4x256xf32>
    %173 = arith.mulf %170, %172 : vector<4x256xf32>
    %174 = tpu.concatenate %128, %134, %140, %146, %149, %155, %161, %167, %173 in 0 : vector<4x256xf32>, vector<4x256xf32>, vector<4x256xf32>, vector<4x256xf32>, vector<4x256xf32>, vector<4x256xf32>, vector<4x256xf32>, vector<4x256xf32>, vector<4x256xf32> -> vector<36x256xf32>
    %c0_19 = arith.constant 0 : index
    %c0_20 = arith.constant 0 : index
    %175 = vector.load %arg4[%c0_19, %c0_20] : memref<4x36xf32, #tpu.memory_space<vmem>>, vector<4x36xf32>
    %cst_21 = arith.constant dense<0.000000e+00> : vector<4x256xf32>
    %176 = tpu.matmul %175, %174, %cst_21 {dimension_numbers = #tpu.dot_dimension_numbers<[1], [0], [0], [1], [0, 0, 1, 1], [], []>} : vector<4x36xf32>, vector<36x256xf32>, vector<4x256xf32> -> vector<4x256xf32>
    %c0_22 = arith.constant 0 : index
    %c0_23 = arith.constant 0 : index
    %177 = vector.load %arg5[%c0_22, %c0_23] : memref<4x1xf32, #tpu.memory_space<vmem>>, vector<4x1xf32>
    %178 = vector.broadcast %177 : vector<4x1xf32> to vector<4x256xf32>
    %179 = arith.addf %176, %178 : vector<4x256xf32>
    %c0_24 = arith.constant 0 : index
    %c0_25 = arith.constant 0 : index
    %c0_26 = arith.constant 0 : index
    %180 = vector.load %arg9[%c0_24, %c0_25, %c0_26] : memref<1x4x256xf32, #tpu.memory_space<vmem>>, vector<1x4x256xf32>
    %181 = vector.shape_cast %180 : vector<1x4x256xf32> to vector<4x256xf32>
    %182 = vector.shape_cast %179 : vector<4x256xf32> to vector<1x4x256xf32>
    tpu.vector_store %arg9[%c0_24, %c0_25, %c0_26], %182 {strides = array<i32>} : memref<1x4x256xf32, #tpu.memory_space<vmem>>, vector<1x4x256xf32>,
    return
  }
  func.func @transform_0(%arg0: i32) -> (i32, i32, i32) {
    %c0_i32 = arith.constant 0 : i32
    %c0_i32_0 = arith.constant 0 : i32
    %c0_i32_1 = arith.constant 0 : i32
    return %arg0, %c0_i32, %c0_i32_0 : i32, i32, i32
  }
  func.func @transform_1(%arg0: i32) -> (i32, i32) {
    %c0_i32 = arith.constant 0 : i32
    %c0_i32_0 = arith.constant 0 : i32
    %c0_i32_1 = arith.constant 0 : i32
    return %c0_i32, %c0_i32_0 : i32, i32
  }
  func.func @transform_2(%arg0: i32) -> (i32, i32) {
    %c0_i32 = arith.constant 0 : i32
    %c0_i32_0 = arith.constant 0 : i32
    %c0_i32_1 = arith.constant 0 : i32
    return %c0_i32, %c0_i32_0 : i32, i32
  }
  func.func @transform_3(%arg0: i32) -> (i32, i32) {
    %c0_i32 = arith.constant 0 : i32
    %c0_i32_0 = arith.constant 0 : i32
    %c0_i32_1 = arith.constant 0 : i32
    return %c0_i32, %c0_i32_0 : i32, i32
  }
  func.func @transform_4(%arg0: i32) -> (i32, i32) {
    %c0_i32 = arith.constant 0 : i32
    %c0_i32_0 = arith.constant 0 : i32
    %c0_i32_1 = arith.constant 0 : i32
    return %c0_i32, %c0_i32_0 : i32, i32
  }
  func.func @transform_5(%arg0: i32) -> (i32, i32) {
    %c0_i32 = arith.constant 0 : i32
    %c0_i32_0 = arith.constant 0 : i32
    %c0_i32_1 = arith.constant 0 : i32
    return %c0_i32, %c0_i32_0 : i32, i32
  }
  func.func @transform_6(%arg0: i32) -> (i32, i32) {
    %c0_i32 = arith.constant 0 : i32
    %c0_i32_0 = arith.constant 0 : i32
    %c0_i32_1 = arith.constant 0 : i32
    return %c0_i32, %c0_i32_0 : i32, i32
  }
  func.func @transform_7(%arg0: i32) -> (i32, i32) {
    %c0_i32 = arith.constant 0 : i32
    %c0_i32_0 = arith.constant 0 : i32
    %c0_i32_1 = arith.constant 0 : i32
    return %c0_i32, %c0_i32_0 : i32, i32
  }
  func.func @transform_8(%arg0: i32) -> (i32, i32, i32) {
    %c0_i32 = arith.constant 0 : i32
    %c0_i32_0 = arith.constant 0 : i32
    %c0_i32_1 = arith.constant 0 : i32
    return %arg0, %c0_i32, %c0_i32_0 : i32, i32, i32
  }
}

</mosaic_0001>

<bundles_post_ra>
// kernel: conv_mha_v2_forward.1
= control target key start
LH: loop header
LB: loop body
LE: loop exit
PB: predicated region body
PF: predicated region fallthrough
CT: control target
= control target key end

     0   :  { %s1242_s27 = smov 0   ;;  %s1560_s0 = inlined_call_operand.vmem [shape: f32[2,4,256], index: 0, kind: input, shape index: {}]   ;;  %s1561_s1 = inlined_call_operand.vmem [shape: f32[12,4], index: 1, kind: input, shape index: {}]   ;;  %s1562_s2 = inlined_call_operand.vmem [shape: f32[12,1], index: 2, kind: input, shape index: {}]   ;;  %s1563_s3 = inlined_call_operand.vmem [shape: f32[4,36], index: 3, kind: input, shape index: {}]   ;;  %s1564_s4 = inlined_call_operand.vmem [shape: f32[4,1], index: 4, kind: input, shape index: {}]   ;;  %s1565_s5 = inlined_call_operand.vmem [shape: f32[9,256], index: 5, kind: input, shape index: {}, may-alias: {5,6}]   ;;  %s1566_s6 = inlined_call_operand.vmem [shape: f32[9,256], index: 6, kind: input, shape index: {}, may-alias: {5,6}]   ;;  %s1567_s7 = inlined_call_operand.vmem [shape: f32[36,4], index: 7, kind: input, shape index: {}]   ;;  %s1568_s8 = inlined_call_operand.vmem [shape: f32[2,4,256], index: 8, kind: output, shape index: {}]  }
   0x1 LB: > { %s1121_s28 = sadd.s32 4294967295, %s1186_s27   ;;  %p1125_p0 = scmp.ge.s32.totalorder %s1186_s27, 1  ;;  %s1186_s27 = sphi %s1242_s27, %s18_s27  }
   0x2   : > { %p262_p1 = scmp.lt.s32.totalorder %s1186_s27, 3 }
   0x4   : > { %p263_p2 = pnand %p1125_p0, %p262_p1 }
   0x5   : > { %p296_p3 = scmp.lt.s32.totalorder (!%p263_p2), %s1121_s28, 1  ;;  %s1189_s19 = smov (!%p263_p2), 16  }
   0x6   : > { %266 = sbr.rel (%p263_p2) target bundleno = 1094 (0x446), region = 52  ;;  %s1190_s20 = smov (!%p263_p2), 17  }
   0x7   : > { %s1191_s21 = smov (!%p263_p2), 15   ;;  %s1192_s22 = smov (!%p263_p2), 1  }
   0x8   : > { %s1193_s23 = smov (!%p263_p2), 127   ;;  %s1194_s24 = smov (!%p263_p2), 113  }
   0x9   : > { %s1195_s25 = smov (!%p263_p2), 112   ;;  %s1196_s26 = smov (!%p263_p2), 111  }
   0xb   : > { %v309_v0 = vld [vmem:[%s1562_s2] sm:$0xff]  ;;  %v1188_v1 = vmov 0   ;;  %v310_v2 = vld [vmem:[%s1562_s2 + $0x8] sm:$0xf]  ;;  %s1576_s28 = smov (!%p296_p3, %s1121_s28), 1  ;;  %vm332_vm0 = vcmask 1043456  }
   0xc   : > { %1170 = vset.pattern.permute.xlu0 %v1188_v1  ;;  %1171 = vset.pattern.permute.xlu1 %v1188_v1  ;;  %s1150_s11 = sshll.u32 %s1576_s28, 3  ;;  %v307_v4 = vld [vmem:[%s1561_s1] sm:$0xff]  ;;  %vm325_vm1 = vcmask 31744   ;;  %v308_v7 = vld [vmem:[%s1561_s1 + $0x8] sm:$0xf]  ;;  %vm410_vm2 = vcmask 130048  }
   0xd   : > { %313 = vperm.xlu0 %1170, %v309_v0   ;;  %318 = vperm.xlu1 %1171, %v310_v2   ;;  %s300_s14 = scalar_lea.vmem %s1560_s0, %s1150_s11  ;;  %v1311_v22 = vld [vmem:[%s1565_s5] sm:$0xff]  ;;  %v1316_v23 = vld [vmem:[%s1565_s5 + $0x8] sm:$0xff]  ;;  %vm1570_vm3 = vcmask 138240   ;;  %vm424_vm4 = vcmask 121856   ;;  %vm438_vm5 = vcmask 7168   ;;  %vm455_vm6 = vcmask 1039360   ;;  %s305_s9 = scalar_lea.vmem %s1568_s8, %s1150_s11 }
   0xe   : > { %v306_v3 = vld [vmem:[%s300_s14] sm:$0xff]  ;;  %v401_v24 = vperm.slane %v1311_v22, 0  ;;  %v402_v25 = vperm.slane %v1316_v23, 0  ;;  %v415_v27 = vperm.slane %v1311_v22, 1  ;;  %v416_v28 = vperm.slane %v1316_v23, 1 }
   0xf   : > { %322 = vst [vmem:[#allocation1] ss:$2 sm:$0xff] %v306_v3  ;;  %v429_v45 = vperm.slane %v1311_v22, 2  ;;  %v430_v46 = vperm.slane %v1316_v23, 2  ;;  %v447_v50 = vperm.slane %v1311_v22, 4  ;;  %v448_v51 = vperm.slane %v1316_v23, 4 }
  0x10   : > { %v443_v55 = vperm.slane %v1311_v22, 3  ;;  %v444_v56 = vperm.slane %v1316_v23, 3  ;;  %v461_v57 = vperm.slane %v1311_v22, 5  ;;  %v462_v58 = vperm.slane %v1316_v23, 5 }
  0x11   : > { %vm469_vm7 = vcmask 924672   ;;  %vm483_vm8 = vcmask 916480   ;;  %vm497_vm9 = vcmask 908288   ;;  %vm1569_vm10 = vcmask 293888  }
  0x16   : > { %v323_v5 = vld.sshfl [vmem:[#allocation1] sm:$0xff pattern:$0x75316420]  ;;  %v324_v6 = vld.sshfl [vmem:[#allocation1 + $0x8] sm:$0xff pattern:$0x75316420] }
  0x17   : > { %1130 = vmatpush.msk.msra.mxu0 %vm332_vm0, %v323_v5  ;;  %1133 = vmatpush.msk.msra.mxu1 %vm332_vm0, %v324_v6 }
  0x18   : > { %1131 = vmatmul.msk.f32.vlgmr.msra.gmra.mxu0 %vm325_vm1, %v307_v4  ;;  %1134 = vmatmul.msk.f32.vlgmr.msra.gmra.mxu1 %vm325_vm1, %v307_v4 }
  0x20   : > { %1132 = vmatmul.msk.f32.gmra.mxu0 %vm325_vm1, %v308_v7  ;;  %1135 = vmatmul.msk.f32.gmra.mxu1 %vm325_vm1, %v308_v7 }
  0x7f   : > { %v314_v8 = vpop.permute.xlu0 %313  ;;  %v319_v17 = vpop.permute.xlu1 %318 }
  0x95   : > { %v354_v9 = vpop.f32.mrf.mxu0  ;;  %v377_v10 = vpop.f32.mrf.mxu1 }
  0x96   : > { %v355_v11 = vadd.f32 %v354_v9, %v314_v8  ;;  %v378_v12 = vadd.f32 %v377_v10, %v314_v8 }
  0x98   : > { %v1272_v13 = vmax.f32 %v355_v11, 0.0  ;;  %v1274_v14 = vmax.f32 %v378_v12, 0.0 }
  0x9a   : > { %405 = vrot.lane.b32.xlu2 %v1274_v14, %s1189_s19  ;;  %390 = vrot.lane.b32.xlu0 %v1274_v14, %s1190_s20  ;;  %v1355_v59 = vmul.f32 %v447_v50, %v1272_v13  ;;  %v1358_v61 = vmul.f32 %v448_v51, %v1274_v14 }
  0x9b   : > { %394 = vrot.lane.b32.xlu1 %v1272_v13, %s1190_s20 }
  0x9c   : > { %v553_v9 = vrot.slane %v1355_v59, 4  ;;  %v554_v12 = vrot.slane %v1358_v61, 4 }
  0x9d   : > { %v357_v15 = vpop.f32.mrf.mxu0  ;;  %v380_v16 = vpop.f32.mrf.mxu1 }
  0x9e   : > { %v358_v18 = vadd.f32 %v357_v15, %v319_v17  ;;  %v381_v19 = vadd.f32 %v380_v16, %v319_v17 }
  0xa0   : > { %597 = vmatpush.xpose.msra.mxu2 %v358_v18  ;;  %629 = vmatpush.xpose.msra.mxu3 %v381_v19  ;;  %v475_v19 = vperm.slane %v1311_v22, 6 }
  0xa2   : > { %419 = vrot.lane.b32.xlu0 %v1274_v14, %s1191_s21  ;;  %408 = vrot.lane.b32.xlu2 %v1272_v13, %s1189_s19 }
  0xa3   : > { %422 = vrot.lane.b32.xlu1 %v1272_v13, %s1191_s21 }
  0xaa   : > { %436 = vrot.lane.b32.xlu0 %v1272_v13, %s1192_s22  ;;  %433 = vrot.lane.b32.xlu2 %v1274_v14, %s1192_s22 }
  0xab   : > { %451 = vrot.lane.b32.xlu1 %v1272_v13, %s1193_s23 }
  0xb2   : > { %465 = vrot.lane.b32.xlu0 %v1272_v13, %s1194_s24  ;;  %453 = vrot.lane.b32.xlu2 %v1274_v14, %s1193_s23 }
  0xb3   : > { %467 = vrot.lane.b32.xlu1 %v1274_v14, %s1194_s24 }
  0xba   : > { %481 = vrot.lane.b32.xlu0 %v1274_v14, %s1195_s25  ;;  %479 = vrot.lane.b32.xlu2 %v1272_v13, %s1195_s25 }
  0xbb   : > { %493 = vrot.lane.b32.xlu1 %v1272_v13, %s1196_s26 }
  0xc2   : > { %495 = vrot.lane.b32.xlu2 %v1274_v14, %s1196_s26 }
  0xf4   : > { %v406_v20 = vpop.permute.xlu2 %405 }
  0xfc   : > { %v409_v21 = vpop.permute.xlu2 %408 }
  0xfd   : > { %v411_v30 = vsel %vm410_vm2, %v409_v21, %v406_v20  ;;  %v414_v31 = vsel %vm410_vm2, %v406_v20, %v409_v21  ;;  %v476_v20 = vperm.slane %v1316_v23, 6 }
  0xfe   : > { %v1330_v37 = vmul.f32 %v415_v27, %v414_v31  ;;  %v1332_v38 = vmul.f32 %v416_v28, %v411_v30  ;;  %v489_v28 = vperm.slane %v1311_v22, 7  ;;  %v1172_v30 = vld [vmem:[%s1565_s5 + $0x10] ss:$0 sm:$0xff]  ;;  %v1173_v31 = vld [vmem:[%s1565_s5 + $0x18] ss:$0 sm:$0xff] }
 0x104   : > { %v434_v34 = vpop.permute.xlu2 %433 }
 0x10c   : > { %v391_v26 = vpop.permute.xlu0 %390  ;;  %v454_v52 = vpop.permute.xlu2 %453 }
 0x10d   : > { %v395_v29 = vpop.permute.xlu1 %394 }
 0x10e   : > { %v397_v32 = vsel %vm1570_vm3, %v395_v29, %v391_v26  ;;  %v400_v33 = vsel %vm1570_vm3, %v391_v26, %v395_v29  ;;  %v490_v29 = vperm.slane %v1316_v23, 7 }
 0x10f   : > { %v1326_v35 = vmul.f32 %v401_v24, %v400_v33  ;;  %v1328_v36 = vmul.f32 %v402_v25, %v397_v32 }
 0x111   : > { %v541_v39 = vrot.slane %v1326_v35, 4  ;;  %v542_v40 = vrot.slane %v1328_v36, 4 }
 0x113   : > { %v569_v41 = vsel %vm332_vm0, %v541_v39, %v1330_v37  ;;  %v570_v42 = vsel %vm332_vm0, %v542_v40, %v1332_v38 }
 0x114   : > { %598 = vmatmul.f32.vlgmr.msra.gmra.mxu2 %v569_v41  ;;  %630 = vmatmul.f32.vlgmr.msra.gmra.mxu3 %v570_v42  ;;  %v420_v43 = vpop.permute.xlu0 %419  ;;  %v731_v44 = vadd.f32 %v570_v42, %v569_v41  ;;  %v480_v16 = vpop.permute.xlu2 %479 }
 0x115   : > { %v423_v47 = vpop.permute.xlu1 %422 }
 0x116   : > { %v425_v48 = vsel %vm424_vm4, %v423_v47, %v420_v43  ;;  %v428_v49 = vsel %vm424_vm4, %v420_v43, %v423_v47  ;;  %732 = vadd.xlane.f32.xlu0 %v731_v44 }
 0x117   : > { %v1346_v53 = vmul.f32 %v429_v45, %v428_v49  ;;  %v1348_v54 = vmul.f32 %v430_v46, %v425_v48 }
 0x119   : > { %v547_v62 = vrot.slane %v1346_v53, 4  ;;  %v548_v63 = vrot.slane %v1348_v54, 4 }
 0x11c   : > { %v437_v60 = vpop.permute.xlu0 %436  ;;  %v496_v33 = vpop.permute.xlu2 %495 }
 0x11d   : > { %v439_v0 = vsel %vm438_vm5, %v437_v60, %v434_v34  ;;  %v442_v1 = vsel %vm438_vm5, %v434_v34, %v437_v60  ;;  %v452_v2 = vpop.permute.xlu1 %451 }
 0x11e   : > { %v1364_v3 = vmul.f32 %v443_v55, %v442_v1  ;;  %v1366_v4 = vmul.f32 %v444_v56, %v439_v0  ;;  %v456_v5 = vsel %vm455_vm6, %v452_v2, %v454_v52  ;;  %v460_v6 = vsel %vm455_vm6, %v454_v52, %v452_v2 }
 0x11f   : > { %v1370_v7 = vmul.f32 %v461_v57, %v456_v5  ;;  %v1372_v8 = vmul.f32 %v462_v58, %v460_v6  ;;  %v510_v6 = vrot.slane %v1332_v38, 4  ;;  %v578_v38 = vld [vmem:[%s1567_s7 + $0x8] sm:$0xff] }
 0x120   : > { %v571_v10 = vsel %vm332_vm0, %v547_v62, %v1364_v3  ;;  %v572_v11 = vsel %vm332_vm0, %v548_v63, %v1366_v4  ;;  %v515_v58 = vrot.slane %v1364_v3, 4  ;;  %v516_v60 = vrot.slane %v1366_v4, 4 }
 0x121   : > { %601 = vmatmul.f32.gmra.mxu2 %v571_v10  ;;  %633 = vmatmul.f32.gmra.mxu3 %v572_v11  ;;  %v734_v13 = vadd.f32 %v572_v11, %v571_v10  ;;  %v573_v14 = vsel %vm332_vm0, %v553_v9, %v1370_v7  ;;  %v574_v15 = vsel %vm332_vm0, %v554_v12, %v1372_v8  ;;  %v521_v45 = vrot.slane %v1370_v7, 4 }
 0x122   : > { %v737_v17 = vadd.f32 %v574_v15, %v573_v14  ;;  %v522_v46 = vrot.slane %v1372_v8, 4  ;;  %v509_v4 = vrot.slane %v1330_v37, 4  ;;  %v533_v7 = vsel %vm332_vm0, %v1346_v53, %v515_v58 }
 0x123   : > { %735 = vadd.xlane.f32.xlu1 %v734_v13  ;;  %v535_v3 = vsel %vm332_vm0, %v1355_v59, %v521_v45  ;;  %v534_v8 = vsel %vm332_vm0, %v1348_v54, %v516_v60  ;;  %v532_v59 = vsel %vm332_vm0, %v1328_v36, %v510_v6  ;;  %v579_v13 = vld [vmem:[%s1567_s7 + $0x10] sm:$0xff] }
 0x124   : > { %v466_v18 = vpop.permute.xlu0 %465  ;;  %738 = vadd.xlane.f32.xlu2 %v737_v17  ;;  %v536_v2 = vsel %vm332_vm0, %v1358_v61, %v522_v46  ;;  %v531_v61 = vsel %vm332_vm0, %v1326_v35, %v509_v4  ;;  %v577_v35 = vld [vmem:[%s1567_s7] sm:$0xff] }
 0x125   : > { %v468_v21 = vpop.permute.xlu1 %467 }
 0x126   : > { %v470_v24 = vsel %vm469_vm7, %v466_v18, %v468_v21  ;;  %v474_v25 = vsel %vm469_vm7, %v468_v21, %v466_v18 }
 0x127   : > { %v477_v26 = vmul.f32 %v475_v19, %v470_v24  ;;  %v478_v27 = vmul.f32 %v476_v20, %v474_v25  ;;  %v580_v19 = vld [vmem:[%s1567_s7 + $0x18] sm:$0xff] }
 0x129   : > { %604 = vmatmul.f32.gmra.mxu2 %v573_v14  ;;  %636 = vmatmul.f32.gmra.mxu3 %v574_v15  ;;  %v559_v34 = vrot.slane %v477_v26, 4  ;;  %v560_v39 = vrot.slane %v478_v27, 4 }
 0x12c   : > { %v482_v32 = vpop.permute.xlu0 %481 }
 0x12d   : > { %v484_v40 = vsel %vm483_vm8, %v480_v16, %v482_v32  ;;  %v488_v41 = vsel %vm483_vm8, %v482_v32, %v480_v16  ;;  %v494_v22 = vpop.permute.xlu1 %493 }
 0x12e   : > { %v491_v42 = vmul.f32 %v489_v28, %v484_v40  ;;  %v492_v23 = vmul.f32 %v490_v29, %v488_v41  ;;  %v498_v43 = vsel %vm497_vm9, %v494_v22, %v496_v33  ;;  %v502_v44 = vsel %vm497_vm9, %v496_v33, %v494_v22 }
 0x12f   : > { %v505_v47 = vmul.f32 %v1172_v30, %v498_v43  ;;  %v506_v48 = vmul.f32 %v1173_v31, %v502_v44 }
 0x130   : > { %v527_v49 = vrot.slane %v491_v42, 4  ;;  %v528_v50 = vrot.slane %v492_v23, 4  ;;  %v575_v51 = vsel %vm332_vm0, %v559_v34, %v491_v42  ;;  %v576_v52 = vsel %vm332_vm0, %v560_v39, %v492_v23 }
 0x131   : > { %1136 = vmatpush.msk.msrb.mxu0 %vm332_vm0, %v505_v47  ;;  %1138 = vmatpush.msk.msrb.mxu1 %vm332_vm0, %v506_v48  ;;  %v740_v55 = vadd.f32 %v576_v52, %v575_v51  ;;  %v565_v56 = vrot.slane %v505_v47, 4  ;;  %v566_v57 = vrot.slane %v506_v48, 4 }
 0x132   : > { %607 = vmatmul.f32.gmra.mxu2 %v575_v51  ;;  %639 = vmatmul.f32.gmra.mxu3 %v576_v52  ;;  %v537_v62 = vsel %vm332_vm0, %v477_v26, %v527_v49  ;;  %v538_v63 = vsel %vm332_vm0, %v478_v27, %v528_v50  ;;  %v581_v27 = vld [vmem:[%s1567_s7 + $0x20] sm:$0xf] }
 0x133   : > { %703 = vmatpush.msrb.mxu0 %v537_v62  ;;  %723 = vmatpush.msrb.mxu1 %v538_v63  ;;  %v743_v0 = vsel %vm332_vm0, %v565_v56, 0.0  ;;  %v744_v1 = vsel %vm332_vm0, %v566_v57, 0.0 }
 0x134   : > { %741 = vadd.xlane.f32.xlu2 %v740_v55  ;;  %v745_v5 = vadd.f32 %v744_v1, %v743_v0 }
 0x135   : > { %724 = vmatpush.msrb.mxu1 %v536_v2  ;;  %704 = vmatpush.msrb.mxu0 %v535_v3 }
 0x136   : > { %746 = vadd.xlane.f32.xlu0 %v745_v5 }
 0x137   : > { %705 = vmatpush.msrb.mxu0 %v533_v7  ;;  %725 = vmatpush.msrb.mxu1 %v534_v8 }
 0x139   : > { %706 = vmatpush.msrb.mxu0 %v531_v61  ;;  %726 = vmatpush.msrb.mxu1 %v532_v59 }
 0x13a   : > { %610 = vmatmul.f32.gmra.mxu2 %v565_v56  ;;  %642 = vmatmul.f32.gmra.mxu3 %v566_v57 }
 0x13b   : > { %1140 = vmatpush.msk.msra.mxu0 %vm332_vm0, %v505_v47  ;;  %1142 = vmatpush.msk.msra.mxu1 %vm332_vm0, %v506_v48 }
 0x13d   : > { %800 = vmatpush.msra.mxu0 %v537_v62  ;;  %820 = vmatpush.msra.mxu1 %v538_v63 }
 0x13f   : > { %801 = vmatpush.msra.mxu0 %v535_v3  ;;  %821 = vmatpush.msra.mxu1 %v536_v2 }
 0x141   : > { %802 = vmatpush.msra.mxu0 %v533_v7  ;;  %822 = vmatpush.msra.mxu1 %v534_v8 }
 0x143   : > { %803 = vmatpush.msra.mxu0 %v531_v61  ;;  %823 = vmatpush.msra.mxu1 %v532_v59 }
 0x189   : > { %v733_v36 = vpop.xlane.xlu0 %732 }
 0x18a   : > { %v748_v37 = vmul.f32 %v733_v36, %v577_v35  ;;  %v1005_v36 = vld [vmem:[%s1564_s4] sm:$0xf] }
 0x18c   : > { %753 = vxpose.xlu2.b32.start [1/5] (short) (narrow) %v748_v37, 8 }
 0x196   : > { %v736_v53 = vpop.xlane.xlu1 %735 }
 0x197   : > { %v599_v54 = vpop.f32.mrf.mxu2  ;;  %v631_v9 = vpop.f32.mrf.mxu3  ;;  %v749_v10 = vmul.f32 %v736_v53, %v578_v38 }
 0x198   : > { %v632_v11 = vadd.f32 %v631_v9, %v599_v54  ;;  %v739_v14 = vpop.xlane.xlu2 %738  ;;  %v1174_v54 = vld [vmem:[%s1566_s6 + $0x10] ss:$0 sm:$0xff]  ;;  %v1175_v9 = vld [vmem:[%s1566_s6 + $0x18] ss:$0 sm:$0xff] }
 0x199   : > { %754 = vxpose.xlu2.b32.cont [2/5] (short) (narrow) %v749_v10, 8  ;;  %v750_v15 = vmul.f32 %v739_v14, %v579_v13 }
 0x19a   : > { %v646_v12 = vmul.f32 %v632_v11, %v577_v35 }
 0x19c   : > { %651 = vxpose.xlu1.b32.start [1/5] (short) (narrow) %v646_v12, 8 }
 0x1a1   : > { %755 = vxpose.xlu2.b32.cont [3/5] (short) (narrow) %v750_v15, 8 }
 0x1a4   : > { %v602_v16 = vpop.f32.mrf.mxu2  ;;  %v634_v17 = vpop.f32.mrf.mxu3 }
 0x1a5   : > { %v635_v18 = vadd.f32 %v634_v17, %v602_v16  ;;  %v1499_v17 = vld [vmem:[%s1566_s6] sm:$0xff] }
 0x1a7   : > { %v647_v20 = vmul.f32 %v635_v18, %v578_v38  ;;  %v742_v21 = vpop.xlane.xlu2 %741  ;;  %v1504_v18 = vld [vmem:[%s1566_s6 + $0x8] sm:$0xff] }
 0x1a8   : > { %v751_v24 = vmul.f32 %v742_v21, %v580_v19  ;;  %v956_v21 = vperm.slane %v1504_v18, 7 }
 0x1a9   : > { %652 = vxpose.xlu1.b32.cont [2/5] (short) (narrow) %v647_v20, 8  ;;  %v747_v28 = vpop.xlane.xlu0 %746  ;;  %v955_v20 = vperm.slane %v1499_v17, 7 }
 0x1aa   : > { %756 = vxpose.xlu2.b32.cont [4/5] (short) (narrow) %v751_v24, 8  ;;  %v752_v31 = vmul.f32 %v747_v28, %v581_v27 }
 0x1ac   : > { %v605_v25 = vpop.f32.mrf.mxu2  ;;  %v637_v26 = vpop.f32.mrf.mxu3 }
 0x1ad   : > { %v638_v29 = vadd.f32 %v637_v26, %v605_v25  ;;  %v929_v26 = vperm.slane %v1499_v17, 5 }
 0x1af   : > { %v648_v30 = vmul.f32 %v638_v29, %v579_v13 }
 0x1b1   : > { %653 = vxpose.xlu1.b32.cont [3/5] (short) (narrow) %v648_v30, 8 }
 0x1b2   : > { %757 = vxpose.xlu2.b32.end [5/5] (short) (narrow) %v752_v31, 8 }
 0x1b5   : > { %v608_v32 = vpop.f32.mrf.mxu2  ;;  %v640_v33 = vpop.f32.mrf.mxu3 }
 0x1b6   : > { %v641_v34 = vadd.f32 %v640_v33, %v608_v32 }
 0x1b8   : > { %v649_v39 = vmul.f32 %v641_v34, %v580_v19  ;;  %v942_v34 = vperm.slane %v1499_v17, 6 }
 0x1ba   : > { %654 = vxpose.xlu1.b32.cont [4/5] (short) (narrow) %v649_v39, 8  ;;  %v943_v39 = vperm.slane %v1504_v18, 6 }
 0x1bd   : > { %v611_v40 = vpop.f32.mrf.mxu2  ;;  %v643_v41 = vpop.f32.mrf.mxu3 }
 0x1be   : > { %v644_v22 = vadd.f32 %v643_v41, %v611_v40  ;;  %v916_v41 = vperm.slane %v1499_v17, 4 }
 0x1c0   : > { %v650_v42 = vmul.f32 %v644_v22, %v581_v27  ;;  %v930_v27 = vperm.slane %v1504_v18, 5  ;;  %v917_v22 = vperm.slane %v1504_v18, 4 }
 0x1c2   : > { %655 = vxpose.xlu1.b32.end [5/5] (short) (narrow) %v650_v42, 8 }
 0x22b   : > { %v769_v43 = vpop.trf.xlu2 }
 0x246   : > { %v667_v23 = vpop.trf.xlu1 }
 0x247   : > { %1137 = vmatmul.msk.f32.vlgmr.msrb.gmra.mxu0 %vm1569_vm10, %v667_v23  ;;  %1139 = vmatmul.msk.f32.vlgmr.msrb.gmra.mxu1 %vm1569_vm10, %v667_v23 }
 0x24f   : > { %1141 = vmatmul.msk.f32.vlgmr.msra.gmra.mxu0 %vm1569_vm10, %v769_v43  ;;  %1143 = vmatmul.msk.f32.vlgmr.msra.gmra.mxu1 %vm1569_vm10, %v769_v43 }
 0x2c4   : > { %v708_v44 = vpop.f32.mrf.mxu0  ;;  %v728_v45 = vpop.f32.mrf.mxu1 }
 0x2cc   : > { %v805_v46 = vpop.f32.mrf.mxu0  ;;  %v825_v47 = vpop.f32.mrf.mxu1 }
 0x2cd   : > { %v806_v48 = vadd.f32 1e-07, %v805_v46  ;;  %v826_v49 = vadd.f32 1e-07, %v825_v47 }
 0x2cf   : > { %1176 = vrcp.f32 %v806_v48  ;;  %v839_v57 = vand.u32 2147483648, %v806_v48  ;;  %v837_v62 = vand.u32 2147483647, %v806_v48  ;;  %v854_v63 = vand.u32 2147483648, %v826_v49 }
 0x2d0   : > { %1178 = vrcp.f32 %v826_v49  ;;  %v852_v1 = vand.u32 2147483647, %v826_v49  ;;  %vm833_vm13 = vweird.f32 %v806_v48  ;;  %vm848_vm15 = vweird.f32 %v826_v49 }
 0x2d1   : > { %v840_v5 = vor.u32 1.1754944e-38, %v839_v57  ;;  %vm838_vm1 = vcmp.eq.f32.partialorder %v837_v62, 8.507059e+37  ;;  %v855_v6 = vor.u32 1.1754944e-38, %v854_v63  ;;  %v912_v63 = vperm.slane %v1499_v17, 3 }
 0x2d2   : > { %vm853_vm3 = vcmp.eq.f32.partialorder %v852_v1, 8.507059e+37 }
 0x2d5   : > { %v1177_v50 = vpop.eup %1176 }
 0x2d6   : > { %v1179_v51 = vpop.eup %1178  ;;  %v829_v52 = vmul.f32 %v1177_v50, %v806_v48  ;;  %vm834_vm11 = vweird.f32 %v1177_v50 }
 0x2d7   : > { %v844_v55 = vmul.f32 %v1179_v51, %v826_v49  ;;  %vm849_vm12 = vweird.f32 %v1179_v51  ;;  %vm835_vm14 = vmor %vm833_vm13, %vm834_vm11 }
 0x2d8   : > { %v830_v56 = vsub.f32 1.0, %v829_v52  ;;  %vm850_vm10 = vmor %vm848_vm15, %vm849_vm12 }
 0x2d9   : > { %v845_v58 = vsub.f32 1.0, %v844_v55 }
 0x2da   : > { %v831_v60 = vmul.f32 %v1177_v50, %v830_v56 }
 0x2db   : > { %v846_v0 = vmul.f32 %v1179_v51, %v845_v58 }
 0x2dc   : > { %v832_v2 = vadd.f32 %v1177_v50, %v831_v60 }
 0x2dd   : > { %v847_v3 = vadd.f32 %v1179_v51, %v846_v0  ;;  %v913_v0 = vperm.slane %v1504_v18, 3 }
 0x2de   : > { %v836_v4 = vsel %vm835_vm14, %v1177_v50, %v832_v2 }
 0x2df   : > { %v841_v7 = vsel %vm838_vm1, %v840_v5, %v836_v4  ;;  %v851_v8 = vsel %vm850_vm10, %v1179_v51, %v847_v3  ;;  %v899_v4 = vperm.slane %v1499_v17, 2 }
 0x2e0   : > { %v1447_v61 = vmul.f32 %v841_v7, %v708_v44  ;;  %v856_v59 = vsel %vm853_vm3, %v855_v6, %v851_v8  ;;  %v900_v6 = vperm.slane %v1504_v18, 2  ;;  %vm1571_vm3 = vcmask 138240  }
 0x2e1   : > { %v1449_v35 = vmul.f32 %v856_v59, %v728_v45 }
 0x2e2   : > { %946 = vrot.lane.b32.xlu0 %v1447_v61, %s1195_s25  ;;  %v918_v51 = vmul.f32 %v916_v41, %v1447_v61 }
 0x2e3   : > { %877 = vrot.lane.b32.xlu1 %v1449_v35, %s1189_s19  ;;  %903 = vrot.lane.b32.xlu2 %v1449_v35, %s1192_s22  ;;  %v919_v52 = vmul.f32 %v917_v22, %v1449_v35 }
 0x2ea   : > { %948 = vrot.lane.b32.xlu0 %v1449_v35, %s1195_s25 }
 0x2f2   : > { %959 = vrot.lane.b32.xlu0 %v1447_v61, %s1196_s26 }
 0x2fa   : > { %961 = vrot.lane.b32.xlu0 %v1449_v35, %s1196_s26 }
 0x302   : > { %920 = vrot.lane.b32.xlu0 %v1447_v61, %s1193_s23 }
 0x30a   : > { %922 = vrot.lane.b32.xlu0 %v1449_v35, %s1193_s23 }
 0x312   : > { %933 = vrot.lane.b32.xlu0 %v1447_v61, %s1194_s24 }
 0x31a   : > { %935 = vrot.lane.b32.xlu0 %v1449_v35, %s1194_s24 }
 0x322   : > { %906 = vrot.lane.b32.xlu0 %v1447_v61, %s1192_s22 }
 0x32a   : > { %880 = vrot.lane.b32.xlu0 %v1447_v61, %s1189_s19 }
 0x332   : > { %890 = vrot.lane.b32.xlu0 %v1449_v35, %s1191_s21 }
 0x33a   : > { %893 = vrot.lane.b32.xlu0 %v1447_v61, %s1191_s21 }
 0x33d   : > { %v904_v62 = vpop.permute.xlu2 %903 }
 0x342   : > { %863 = vrot.lane.b32.xlu0 %v1449_v35, %s1190_s20 }
 0x34a   : > { %867 = vrot.lane.b32.xlu0 %v1447_v61, %s1190_s20 }
 0x352   : > { %1008 = vperm.xlu0 %1170, %v1005_v36  }
 0x354   : > { %v947_v37 = vpop.permute.xlu0 %946 }
 0x35c   : > { %v949_v38 = vpop.permute.xlu0 %948 }
 0x35d   : > { %v950_v24 = vsel %vm483_vm8, %v947_v37, %v949_v38  ;;  %v954_v25 = vsel %vm483_vm8, %v949_v38, %v947_v37 }
 0x35e   : > { %v957_v30 = vmul.f32 %v955_v20, %v950_v24  ;;  %v958_v31 = vmul.f32 %v956_v21, %v954_v25 }
 0x360   : > { %v992_v42 = vrot.slane %v957_v30, 4  ;;  %v993_v23 = vrot.slane %v958_v31, 4 }
 0x364   : > { %v960_v53 = vpop.permute.xlu0 %959 }
 0x36c   : > { %v962_v10 = vpop.permute.xlu0 %961 }
 0x36d   : > { %v963_v11 = vsel %vm497_vm9, %v960_v53, %v962_v10  ;;  %v967_v12 = vsel %vm497_vm9, %v962_v10, %v960_v53  ;;  %v886_v10 = vperm.slane %v1499_v17, 1 }
 0x36e   : > { %v970_v13 = vmul.f32 %v1174_v54, %v963_v11  ;;  %v971_v14 = vmul.f32 %v1175_v9, %v967_v12  ;;  %v878_v9 = vpop.permute.xlu1 %877  ;;  %v887_v11 = vperm.slane %v1504_v18, 1 }
 0x370   : > { %1144 = vmatpush.msk.msrb.mxu0 %vm332_vm0, %v970_v13  ;;  %1146 = vmatpush.msk.msrb.mxu1 %vm332_vm0, %v971_v14 }
 0x374   : > { %v921_v15 = vpop.permute.xlu0 %920 }
 0x37c   : > { %v923_v16 = vpop.permute.xlu0 %922 }
 0x37d   : > { %v924_v28 = vsel %vm455_vm6, %v921_v15, %v923_v16  ;;  %v928_v29 = vsel %vm455_vm6, %v923_v16, %v921_v15  ;;  %v873_v16 = vperm.slane %v1499_v17, 0 }
 0x37e   : > { %v931_v32 = vmul.f32 %v929_v26, %v924_v28  ;;  %v932_v33 = vmul.f32 %v930_v27, %v928_v29  ;;  %v1004_v29 = vld [vmem:[%s1563_s3] sm:$0xf] }
 0x380   : > { %v986_v45 = vrot.slane %v931_v32, 4  ;;  %v987_v46 = vrot.slane %v932_v33, 4 }
 0x382   : > { %v1000_v55 = vsel %vm332_vm0, %v918_v51, %v986_v45  ;;  %v1001_v56 = vsel %vm332_vm0, %v919_v52, %v987_v46 }
 0x384   : > { %v934_v19 = vpop.permute.xlu0 %933 }
 0x38c   : > { %v936_v40 = vpop.permute.xlu0 %935 }
 0x38d   : > { %v937_v43 = vsel %vm469_vm7, %v934_v19, %v936_v40  ;;  %v941_v44 = vsel %vm469_vm7, %v936_v40, %v934_v19  ;;  %v874_v19 = vperm.slane %v1504_v18, 0 }
 0x38e   : > { %v944_v47 = vmul.f32 %v942_v34, %v937_v43  ;;  %v945_v48 = vmul.f32 %v943_v39, %v941_v44 }
 0x390   : > { %v1002_v49 = vsel %vm332_vm0, %v944_v47, %v992_v42  ;;  %v1003_v50 = vsel %vm332_vm0, %v945_v48, %v993_v23 }
 0x391   : > { %1032 = vmatpush.msrb.mxu0 %v1002_v49  ;;  %1052 = vmatpush.msrb.mxu1 %v1003_v50 }
 0x393   : > { %1033 = vmatpush.msrb.mxu0 %v1000_v55  ;;  %1053 = vmatpush.msrb.mxu1 %v1001_v56 }
 0x394   : > { %v907_v57 = vpop.permute.xlu0 %906 }
 0x395   : > { %v908_v1 = vsel %vm438_vm5, %v907_v57, %v904_v62  ;;  %v911_v2 = vsel %vm438_vm5, %v904_v62, %v907_v57 }
 0x396   : > { %v914_v5 = vmul.f32 %v912_v63, %v911_v2  ;;  %v915_v3 = vmul.f32 %v913_v0, %v908_v1 }
 0x398   : > { %v980_v59 = vrot.slane %v914_v5, 4  ;;  %v981_v35 = vrot.slane %v915_v3, 4 }
 0x39c   : > { %v881_v58 = vpop.permute.xlu0 %880 }
 0x39d   : > { %v882_v12 = vsel %vm410_vm2, %v881_v58, %v878_v9  ;;  %v885_v13 = vsel %vm410_vm2, %v878_v9, %v881_v58  ;;  %vm1573_vm2 = vcmask 293888  }
 0x39e   : > { %v888_v14 = vmul.f32 %v886_v10, %v885_v13  ;;  %v889_v15 = vmul.f32 %v887_v11, %v882_v12  ;;  %vm1574_vm5 = vmmov %vm1573_vm2 }
 0x3a0   : > { %v974_v25 = vrot.slane %v888_v14, 4  ;;  %v975_v26 = vrot.slane %v889_v15, 4 }
 0x3a4   : > { %v891_v60 = vpop.permute.xlu0 %890 }
 0x3ac   : > { %v894_v7 = vpop.permute.xlu0 %893 }
 0x3ad   : > { %v895_v8 = vsel %vm424_vm4, %v894_v7, %v891_v60  ;;  %v898_v61 = vsel %vm424_vm4, %v891_v60, %v894_v7  ;;  %vm1572_vm4 = vmmov %vm1571_vm3 }
 0x3ae   : > { %v901_v36 = vmul.f32 %v899_v4, %v898_v61  ;;  %v902_v37 = vmul.f32 %v900_v6, %v895_v8 }
 0x3b0   : > { %v998_v38 = vsel %vm332_vm0, %v901_v36, %v980_v59  ;;  %v999_v53 = vsel %vm332_vm0, %v902_v37, %v981_v35 }
 0x3b1   : > { %1034 = vmatpush.msrb.mxu0 %v998_v38  ;;  %1054 = vmatpush.msrb.mxu1 %v999_v53 }
 0x3b4   : > { %v864_v54 = vpop.permute.xlu0 %863 }
 0x3bc   : > { %v868_v20 = vpop.permute.xlu0 %867 }
 0x3bd   : > { %v869_v21 = vsel %vm1571_vm3, %v868_v20, %v864_v54  ;;  %v872_v24 = vsel %vm1572_vm4, %v864_v54, %v868_v20 }
 0x3be   : > { %v875_v27 = vmul.f32 %v873_v16, %v872_v24  ;;  %v876_v28 = vmul.f32 %v874_v19, %v869_v21 }
 0x3c0   : > { %v996_v30 = vsel %vm332_vm0, %v875_v27, %v974_v25  ;;  %v997_v17 = vsel %vm332_vm0, %v876_v28, %v975_v26 }
 0x3c1   : > { %1035 = vmatpush.msrb.mxu0 %v996_v30  ;;  %1055 = vmatpush.msrb.mxu1 %v997_v17 }
 0x3c2   : > { %1145 = vmatmul.msk.f32.vlgmr.msrb.gmra.mxu0 %vm1573_vm2, %v1004_v29  ;;  %1147 = vmatmul.msk.f32.vlgmr.msrb.gmra.mxu1 %vm1574_vm5, %v1004_v29 }
 0x3c4   : > { %v1009_v18 = vpop.permute.xlu0 %1008 }
 0x43f   : > { %v1037_v31 = vpop.f32.mrf.mxu0  ;;  %v1057_v32 = vpop.f32.mrf.mxu1 }
 0x440   : > { %v1058_v33 = vadd.f32 %v1057_v32, %v1009_v18  ;;  %v1038_v34 = vadd.f32 %v1037_v31, %v1009_v18 }
 0x442   : > { %v1062_v39 = vrot.slane %v1058_v33, 4 }
 0x444   : > { %v1063_v40 = vsel %vm332_vm0, %v1038_v34, %v1062_v39 }
 0x445   : > { %1065 = vst [vmem:[%s305_s9] sm:$0xff] %v1063_v40 }
 0x446 PF: > { %s18_s27 = sadd.s32 1, %s1186_s27  }
 0x447   : > { %p15_p4 = scmp.ge.s32.totalorder %s18_s27, 4  }
 0x449   :  { %17 = sbr.rel (!%p15_p4) target bundleno = 1 (0x1), region = 82 }

</bundles_post_ra>
